<compile_context>
chip_gen: v5e
topology: v5e:2x2
jax: 0.10.0
libtpu: 0.0.40
codegen_flags: <defaults>
</compile_context>

<pallas_src>
import jax
import jax.numpy as jnp
from jax.experimental import pallas as pl
from jax.experimental.pallas import tpu as pltpu

LANE = 128
NEG_INF = -1e30  # surrogate -inf for padded class logits


def _make_kernel(TB, L, Dp):
    def kernel(bow_ref, emb_ref, w_ref, b_ref, out_ref, feat_ref):
        # bow_ref : (Bp*L,) int32 in SMEM  (scalar prefetch, flattened token ids)
        # emb_ref : (V, Dp)  f32 in VMEM   (full table, resident across grid)
        # w_ref   : (Dp, Cp) f32 in VMEM   (pre-transposed, zero-padded)
        # b_ref   : (1, Cp)  f32 in VMEM   (padded classes = -1e30)
        # out_ref : (TB, Cp) f32           (lane-dense output tile)
        # feat_ref: (TB, Dp) f32 scratch   (bag-summed features)
        base = pl.program_id(0) * TB
        zero_row = jnp.zeros((1, Dp), jnp.float32)  # hoisted out of the loops

        # ---- fused EmbeddingBag(mode='sum'): in-VMEM gather + bag-sum -------------
        for r in range(TB):                              # static unroll (TB small)
            acc = zero_row
            for l in range(L):                           # static unroll (bag length)
                tok = bow_ref[(base + r) * L + l]        # scalar index from SMEM
                acc = acc + emb_ref[pl.ds(tok, 1), :]    # (1, Dp) dynamic row load
            feat_ref[pl.ds(r, 1), :] = acc

        # ---- Linear: feats @ W^T + b (one (TB,128)@(128,128) MXU pass) ------------
        logits = jnp.dot(feat_ref[...], w_ref[...],
                         preferred_element_type=jnp.float32) + b_ref[...]

        # ---- log_softmax over classes (padded classes already at -1e30) -----------
        m = jnp.max(logits, axis=1, keepdims=True)
        z = logits - m
        lse = jnp.log(jnp.sum(jnp.exp(z), axis=1, keepdims=True))
        out_ref[...] = z - lse

    return kernel


def logreg_forward(bow, emb_table, lin_w, lin_b, *, tb=8):
    """bow: (B, L) int32 token ids; emb_table: (V, D); lin_w: (C, D); lin_b: (C,)."""
    B, L = bow.shape
    V, D = emb_table.shape
    C = lin_w.shape[0]

    Dp = pl.cdiv(D, LANE) * LANE          # contraction dim -> multiple of 128
    Cp = pl.cdiv(C, LANE) * LANE          # class dim -> lane-dense output
    TB = min(tb, B)                       # batch tile (raise for large B)
    Bp = pl.cdiv(B, TB) * TB
    nb = Bp // TB

    # Padded / pre-transposed parameters.
    emb_p = jnp.zeros((V, Dp), jnp.float32).at[:, :D].set(emb_table.astype(jnp.float32))
    w_p = jnp.zeros((Dp, Cp), jnp.float32).at[:D, :C].set(lin_w.astype(jnp.float32).T)
    b_p = jnp.full((1, Cp), NEG_INF, jnp.float32).at[0, :C].set(lin_b.astype(jnp.float32))

    # Token indices: pad batch (token 0, sliced off later), flatten for SMEM.
    bow_p = jnp.zeros((Bp, L), jnp.int32).at[:B, :].set(bow.astype(jnp.int32))
    bow_flat = bow_p.reshape(Bp * L)

    kernel = _make_kernel(TB, L, Dp)

    grid_spec = pltpu.PrefetchScalarGridSpec(
        num_scalar_prefetch=1,
        grid=(nb,),
        in_specs=[
            pl.BlockSpec((V, Dp), lambda i, bow: (0, 0)),    # embedding table
            pl.BlockSpec((Dp, Cp), lambda i, bow: (0, 0)),   # W^T (padded)
            pl.BlockSpec((1, Cp), lambda i, bow: (0, 0)),    # bias (padded)
        ],
        out_specs=pl.BlockSpec((TB, Cp), lambda i, bow: (i, 0)),
        scratch_shapes=[pltpu.VMEM((TB, Dp), jnp.float32)],
    )

    out = pl.pallas_call(
        kernel,
        out_shape=jax.ShapeDtypeStruct((Bp, Cp), jnp.float32),
        grid_spec=grid_spec,
        compiler_params=pltpu.CompilerParams(
            dimension_semantics=("parallel",)),   # batch axis -> both TCs on v7x
    )(bow_flat, emb_p, w_p, b_p)

    return out[:B, :C]


if __name__ == "__main__":
    # Shapes consistent with the module: EmbeddingBag(V, V) with identity weights
    # (so embed dim D == V), Linear(V, C), one length-L bag per batch row.
    B, L, V, C = 8, 8, 32, 4
    D = V

    key = jax.random.PRNGKey(0)
    k_w, k_b, k_idx = jax.random.split(key, 3)

    emb_table = jnp.eye(V, dtype=jnp.float32)        # torch.eye(len(TEXT.vocab))
    bound = 1.0 / (D ** 0.5)                         # nn.Linear default init bound
    lin_w = jax.random.uniform(k_w, (C, D), minval=-bound, maxval=bound,
                               dtype=jnp.float32)
    lin_b = jax.random.uniform(k_b, (C,), minval=-bound, maxval=bound,
                               dtype=jnp.float32)
    bow = jax.random.randint(k_idx, (B, L), 0, V, dtype=jnp.int32)

    out = logreg_forward(bow, emb_table, lin_w, lin_b)
    out = jax.block_until_ready(out)

    # Pure-JAX reference: EmbeddingBag(sum) -> Linear -> log_softmax.
    feats = jnp.take(emb_table, bow, axis=0).sum(axis=1)
    ref = jax.nn.log_softmax(feats @ lin_w.T + lin_b, axis=1)
    assert out.shape == (B, C)
    assert jnp.allclose(out, ref, atol=1e-5, rtol=1e-5)

    print("KERNEL_OK")
</pallas_src>

<mosaic_0001>
module attributes {stable_mosaic.version = 11 : i64} {
  func.func @kernel(%arg0: i32, %arg1: memref<64xi32, #tpu.memory_space<smem>>, %arg2: memref<32x128xf32, #tpu.memory_space<vmem>>, %arg3: memref<128x128xf32, #tpu.memory_space<vmem>>, %arg4: memref<1x128xf32, #tpu.memory_space<vmem>>, %arg5: memref<8x128xf32, #tpu.memory_space<vmem>>, %arg6: memref<8x128xf32, #tpu.memory_space<vmem>>) attributes {dimension_semantics = [#tpu.dimension_semantics<parallel>], iteration_bounds = array<i64: 1>, scalar_prefetch = 1 : i64, scratch_operands = 1 : i64, tpu.core_type = #tpu.core_type<tc>, window_params = [{pipeline_mode = #tpu.pipeline_mode<synchronous>, transform_indices = @transform_0, window_bounds = array<i64: 32, 128>}, {pipeline_mode = #tpu.pipeline_mode<synchronous>, transform_indices = @transform_1, window_bounds = array<i64: 128, 128>}, {pipeline_mode = #tpu.pipeline_mode<synchronous>, transform_indices = @transform_2, window_bounds = array<i64: 1, 128>}, {transform_indices = @transform_3, window_bounds = array<i64: 8, 128>}]} {
    %c8_i32 = arith.constant 8 : i32
    %0 = arith.muli %arg0, %c8_i32 : i32
    %cst = arith.constant 0.000000e+00 : f32
    %1 = vector.broadcast %cst : f32 to vector<1x128xf32>
    %c0_i32 = arith.constant 0 : i32
    %2 = arith.addi %0, %c0_i32 : i32
    %c8_i32_0 = arith.constant 8 : i32
    %3 = arith.muli %2, %c8_i32_0 : i32
    %c0_i32_1 = arith.constant 0 : i32
    %4 = arith.addi %3, %c0_i32_1 : i32
    %5 = arith.index_cast %4 : i32 to index
    %6 = memref.load %arg1[%5] : memref<64xi32, #tpu.memory_space<smem>>
    %7 = arith.index_cast %6 : i32 to index
    %c0 = arith.constant 0 : index
    %8 = vector.load %arg2[%7, %c0] : memref<32x128xf32, #tpu.memory_space<vmem>>, vector<1x128xf32>
    %9 = arith.addf %1, %8 : vector<1x128xf32>
    %c0_i32_2 = arith.constant 0 : i32
    %10 = arith.addi %0, %c0_i32_2 : i32
    %c8_i32_3 = arith.constant 8 : i32
    %11 = arith.muli %10, %c8_i32_3 : i32
    %c1_i32 = arith.constant 1 : i32
    %12 = arith.addi %11, %c1_i32 : i32
    %13 = arith.index_cast %12 : i32 to index
    %14 = memref.load %arg1[%13] : memref<64xi32, #tpu.memory_space<smem>>
    %15 = arith.index_cast %14 : i32 to index
    %c0_4 = arith.constant 0 : index
    %16 = vector.load %arg2[%15, %c0_4] : memref<32x128xf32, #tpu.memory_space<vmem>>, vector<1x128xf32>
    %17 = arith.addf %9, %16 : vector<1x128xf32>
    %c0_i32_5 = arith.constant 0 : i32
    %18 = arith.addi %0, %c0_i32_5 : i32
    %c8_i32_6 = arith.constant 8 : i32
    %19 = arith.muli %18, %c8_i32_6 : i32
    %c2_i32 = arith.constant 2 : i32
    %20 = arith.addi %19, %c2_i32 : i32
    %21 = arith.index_cast %20 : i32 to index
    %22 = memref.load %arg1[%21] : memref<64xi32, #tpu.memory_space<smem>>
    %23 = arith.index_cast %22 : i32 to index
    %c0_7 = arith.constant 0 : index
    %24 = vector.load %arg2[%23, %c0_7] : memref<32x128xf32, #tpu.memory_space<vmem>>, vector<1x128xf32>
    %25 = arith.addf %17, %24 : vector<1x128xf32>
    %c0_i32_8 = arith.constant 0 : i32
    %26 = arith.addi %0, %c0_i32_8 : i32
    %c8_i32_9 = arith.constant 8 : i32
    %27 = arith.muli %26, %c8_i32_9 : i32
    %c3_i32 = arith.constant 3 : i32
    %28 = arith.addi %27, %c3_i32 : i32
    %29 = arith.index_cast %28 : i32 to index
    %30 = memref.load %arg1[%29] : memref<64xi32, #tpu.memory_space<smem>>
    %31 = arith.index_cast %30 : i32 to index
    %c0_10 = arith.constant 0 : index
    %32 = vector.load %arg2[%31, %c0_10] : memref<32x128xf32, #tpu.memory_space<vmem>>, vector<1x128xf32>
    %33 = arith.addf %25, %32 : vector<1x128xf32>
    %c0_i32_11 = arith.constant 0 : i32
    %34 = arith.addi %0, %c0_i32_11 : i32
    %c8_i32_12 = arith.constant 8 : i32
    %35 = arith.muli %34, %c8_i32_12 : i32
    %c4_i32 = arith.constant 4 : i32
    %36 = arith.addi %35, %c4_i32 : i32
    %37 = arith.index_cast %36 : i32 to index
    %38 = memref.load %arg1[%37] : memref<64xi32, #tpu.memory_space<smem>>
    %39 = arith.index_cast %38 : i32 to index
    %c0_13 = arith.constant 0 : index
    %40 = vector.load %arg2[%39, %c0_13] : memref<32x128xf32, #tpu.memory_space<vmem>>, vector<1x128xf32>
    %41 = arith.addf %33, %40 : vector<1x128xf32>
    %c0_i32_14 = arith.constant 0 : i32
    %42 = arith.addi %0, %c0_i32_14 : i32
    %c8_i32_15 = arith.constant 8 : i32
    %43 = arith.muli %42, %c8_i32_15 : i32
    %c5_i32 = arith.constant 5 : i32
    %44 = arith.addi %43, %c5_i32 : i32
    %45 = arith.index_cast %44 : i32 to index
    %46 = memref.load %arg1[%45] : memref<64xi32, #tpu.memory_space<smem>>
    %47 = arith.index_cast %46 : i32 to index
    %c0_16 = arith.constant 0 : index
    %48 = vector.load %arg2[%47, %c0_16] : memref<32x128xf32, #tpu.memory_space<vmem>>, vector<1x128xf32>
    %49 = arith.addf %41, %48 : vector<1x128xf32>
    %c0_i32_17 = arith.constant 0 : i32
    %50 = arith.addi %0, %c0_i32_17 : i32
    %c8_i32_18 = arith.constant 8 : i32
    %51 = arith.muli %50, %c8_i32_18 : i32
    %c6_i32 = arith.constant 6 : i32
    %52 = arith.addi %51, %c6_i32 : i32
    %53 = arith.index_cast %52 : i32 to index
    %54 = memref.load %arg1[%53] : memref<64xi32, #tpu.memory_space<smem>>
    %55 = arith.index_cast %54 : i32 to index
    %c0_19 = arith.constant 0 : index
    %56 = vector.load %arg2[%55, %c0_19] : memref<32x128xf32, #tpu.memory_space<vmem>>, vector<1x128xf32>
    %57 = arith.addf %49, %56 : vector<1x128xf32>
    %c0_i32_20 = arith.constant 0 : i32
    %58 = arith.addi %0, %c0_i32_20 : i32
    %c8_i32_21 = arith.constant 8 : i32
    %59 = arith.muli %58, %c8_i32_21 : i32
    %c7_i32 = arith.constant 7 : i32
    %60 = arith.addi %59, %c7_i32 : i32
    %61 = arith.index_cast %60 : i32 to index
    %62 = memref.load %arg1[%61] : memref<64xi32, #tpu.memory_space<smem>>
    %63 = arith.index_cast %62 : i32 to index
    %c0_22 = arith.constant 0 : index
    %64 = vector.load %arg2[%63, %c0_22] : memref<32x128xf32, #tpu.memory_space<vmem>>, vector<1x128xf32>
    %65 = arith.addf %57, %64 : vector<1x128xf32>
    %c0_23 = arith.constant 0 : index
    %c0_24 = arith.constant 0 : index
    %66 = vector.load %arg6[%c0_23, %c0_24] : memref<8x128xf32, #tpu.memory_space<vmem>>, vector<1x128xf32>
    tpu.vector_store %arg6[%c0_23, %c0_24], %65 {strides = array<i32>} : memref<8x128xf32, #tpu.memory_space<vmem>>, vector<1x128xf32>,
    %c1_i32_25 = arith.constant 1 : i32
    %67 = arith.addi %0, %c1_i32_25 : i32
    %c8_i32_26 = arith.constant 8 : i32
    %68 = arith.muli %67, %c8_i32_26 : i32
    %c0_i32_27 = arith.constant 0 : i32
    %69 = arith.addi %68, %c0_i32_27 : i32
    %70 = arith.index_cast %69 : i32 to index
    %71 = memref.load %arg1[%70] : memref<64xi32, #tpu.memory_space<smem>>
    %72 = arith.index_cast %71 : i32 to index
    %c0_28 = arith.constant 0 : index
    %73 = vector.load %arg2[%72, %c0_28] : memref<32x128xf32, #tpu.memory_space<vmem>>, vector<1x128xf32>
    %74 = arith.addf %1, %73 : vector<1x128xf32>
    %c1_i32_29 = arith.constant 1 : i32
    %75 = arith.addi %0, %c1_i32_29 : i32
    %c8_i32_30 = arith.constant 8 : i32
    %76 = arith.muli %75, %c8_i32_30 : i32
    %c1_i32_31 = arith.constant 1 : i32
    %77 = arith.addi %76, %c1_i32_31 : i32
    %78 = arith.index_cast %77 : i32 to index
    %79 = memref.load %arg1[%78] : memref<64xi32, #tpu.memory_space<smem>>
    %80 = arith.index_cast %79 : i32 to index
    %c0_32 = arith.constant 0 : index
    %81 = vector.load %arg2[%80, %c0_32] : memref<32x128xf32, #tpu.memory_space<vmem>>, vector<1x128xf32>
    %82 = arith.addf %74, %81 : vector<1x128xf32>
    %c1_i32_33 = arith.constant 1 : i32
    %83 = arith.addi %0, %c1_i32_33 : i32
    %c8_i32_34 = arith.constant 8 : i32
    %84 = arith.muli %83, %c8_i32_34 : i32
    %c2_i32_35 = arith.constant 2 : i32
    %85 = arith.addi %84, %c2_i32_35 : i32
    %86 = arith.index_cast %85 : i32 to index
    %87 = memref.load %arg1[%86] : memref<64xi32, #tpu.memory_space<smem>>
    %88 = arith.index_cast %87 : i32 to index
    %c0_36 = arith.constant 0 : index
    %89 = vector.load %arg2[%88, %c0_36] : memref<32x128xf32, #tpu.memory_space<vmem>>, vector<1x128xf32>
    %90 = arith.addf %82, %89 : vector<1x128xf32>
    %c1_i32_37 = arith.constant 1 : i32
    %91 = arith.addi %0, %c1_i32_37 : i32
    %c8_i32_38 = arith.constant 8 : i32
    %92 = arith.muli %91, %c8_i32_38 : i32
    %c3_i32_39 = arith.constant 3 : i32
    %93 = arith.addi %92, %c3_i32_39 : i32
    %94 = arith.index_cast %93 : i32 to index
    %95 = memref.load %arg1[%94] : memref<64xi32, #tpu.memory_space<smem>>
    %96 = arith.index_cast %95 : i32 to index
    %c0_40 = arith.constant 0 : index
    %97 = vector.load %arg2[%96, %c0_40] : memref<32x128xf32, #tpu.memory_space<vmem>>, vector<1x128xf32>
    %98 = arith.addf %90, %97 : vector<1x128xf32>
    %c1_i32_41 = arith.constant 1 : i32
    %99 = arith.addi %0, %c1_i32_41 : i32
    %c8_i32_42 = arith.constant 8 : i32
    %100 = arith.muli %99, %c8_i32_42 : i32
    %c4_i32_43 = arith.constant 4 : i32
    %101 = arith.addi %100, %c4_i32_43 : i32
    %102 = arith.index_cast %101 : i32 to index
    %103 = memref.load %arg1[%102] : memref<64xi32, #tpu.memory_space<smem>>
    %104 = arith.index_cast %103 : i32 to index
    %c0_44 = arith.constant 0 : index
    %105 = vector.load %arg2[%104, %c0_44] : memref<32x128xf32, #tpu.memory_space<vmem>>, vector<1x128xf32>
    %106 = arith.addf %98, %105 : vector<1x128xf32>
    %c1_i32_45 = arith.constant 1 : i32
    %107 = arith.addi %0, %c1_i32_45 : i32
    %c8_i32_46 = arith.constant 8 : i32
    %108 = arith.muli %107, %c8_i32_46 : i32
    %c5_i32_47 = arith.constant 5 : i32
    %109 = arith.addi %108, %c5_i32_47 : i32
    %110 = arith.index_cast %109 : i32 to index
    %111 = memref.load %arg1[%110] : memref<64xi32, #tpu.memory_space<smem>>
    %112 = arith.index_cast %111 : i32 to index
    %c0_48 = arith.constant 0 : index
    %113 = vector.load %arg2[%112, %c0_48] : memref<32x128xf32, #tpu.memory_space<vmem>>, vector<1x128xf32>
    %114 = arith.addf %106, %113 : vector<1x128xf32>
    %c1_i32_49 = arith.constant 1 : i32
    %115 = arith.addi %0, %c1_i32_49 : i32
    %c8_i32_50 = arith.constant 8 : i32
    %116 = arith.muli %115, %c8_i32_50 : i32
    %c6_i32_51 = arith.constant 6 : i32
    %117 = arith.addi %116, %c6_i32_51 : i32
    %118 = arith.index_cast %117 : i32 to index
    %119 = memref.load %arg1[%118] : memref<64xi32, #tpu.memory_space<smem>>
    %120 = arith.index_cast %119 : i32 to index
    %c0_52 = arith.constant 0 : index
    %121 = vector.load %arg2[%120, %c0_52] : memref<32x128xf32, #tpu.memory_space<vmem>>, vector<1x128xf32>
    %122 = arith.addf %114, %121 : vector<1x128xf32>
    %c1_i32_53 = arith.constant 1 : i32
    %123 = arith.addi %0, %c1_i32_53 : i32
    %c8_i32_54 = arith.constant 8 : i32
    %124 = arith.muli %123, %c8_i32_54 : i32
    %c7_i32_55 = arith.constant 7 : i32
    %125 = arith.addi %124, %c7_i32_55 : i32
    %126 = arith.index_cast %125 : i32 to index
    %127 = memref.load %arg1[%126] : memref<64xi32, #tpu.memory_space<smem>>
    %128 = arith.index_cast %127 : i32 to index
    %c0_56 = arith.constant 0 : index
    %129 = vector.load %arg2[%128, %c0_56] : memref<32x128xf32, #tpu.memory_space<vmem>>, vector<1x128xf32>
    %130 = arith.addf %122, %129 : vector<1x128xf32>
    %c1 = arith.constant 1 : index
    %c0_57 = arith.constant 0 : index
    %131 = vector.load %arg6[%c1, %c0_57] : memref<8x128xf32, #tpu.memory_space<vmem>>, vector<1x128xf32>
    tpu.vector_store %arg6[%c1, %c0_57], %130 {strides = array<i32>} : memref<8x128xf32, #tpu.memory_space<vmem>>, vector<1x128xf32>,
    %c2_i32_58 = arith.constant 2 : i32
    %132 = arith.addi %0, %c2_i32_58 : i32
    %c8_i32_59 = arith.constant 8 : i32
    %133 = arith.muli %132, %c8_i32_59 : i32
    %c0_i32_60 = arith.constant 0 : i32
    %134 = arith.addi %133, %c0_i32_60 : i32
    %135 = arith.index_cast %134 : i32 to index
    %136 = memref.load %arg1[%135] : memref<64xi32, #tpu.memory_space<smem>>
    %137 = arith.index_cast %136 : i32 to index
    %c0_61 = arith.constant 0 : index
    %138 = vector.load %arg2[%137, %c0_61] : memref<32x128xf32, #tpu.memory_space<vmem>>, vector<1x128xf32>
    %139 = arith.addf %1, %138 : vector<1x128xf32>
    %c2_i32_62 = arith.constant 2 : i32
    %140 = arith.addi %0, %c2_i32_62 : i32
    %c8_i32_63 = arith.constant 8 : i32
    %141 = arith.muli %140, %c8_i32_63 : i32
    %c1_i32_64 = arith.constant 1 : i32
    %142 = arith.addi %141, %c1_i32_64 : i32
    %143 = arith.index_cast %142 : i32 to index
    %144 = memref.load %arg1[%143] : memref<64xi32, #tpu.memory_space<smem>>
    %145 = arith.index_cast %144 : i32 to index
    %c0_65 = arith.constant 0 : index
    %146 = vector.load %arg2[%145, %c0_65] : memref<32x128xf32, #tpu.memory_space<vmem>>, vector<1x128xf32>
    %147 = arith.addf %139, %146 : vector<1x128xf32>
    %c2_i32_66 = arith.constant 2 : i32
    %148 = arith.addi %0, %c2_i32_66 : i32
    %c8_i32_67 = arith.constant 8 : i32
    %149 = arith.muli %148, %c8_i32_67 : i32
    %c2_i32_68 = arith.constant 2 : i32
    %150 = arith.addi %149, %c2_i32_68 : i32
    %151 = arith.index_cast %150 : i32 to index
    %152 = memref.load %arg1[%151] : memref<64xi32, #tpu.memory_space<smem>>
    %153 = arith.index_cast %152 : i32 to index
    %c0_69 = arith.constant 0 : index
    %154 = vector.load %arg2[%153, %c0_69] : memref<32x128xf32, #tpu.memory_space<vmem>>, vector<1x128xf32>
    %155 = arith.addf %147, %154 : vector<1x128xf32>
    %c2_i32_70 = arith.constant 2 : i32
    %156 = arith.addi %0, %c2_i32_70 : i32
    %c8_i32_71 = arith.constant 8 : i32
    %157 = arith.muli %156, %c8_i32_71 : i32
    %c3_i32_72 = arith.constant 3 : i32
    %158 = arith.addi %157, %c3_i32_72 : i32
    %159 = arith.index_cast %158 : i32 to index
    %160 = memref.load %arg1[%159] : memref<64xi32, #tpu.memory_space<smem>>
    %161 = arith.index_cast %160 : i32 to index
    %c0_73 = arith.constant 0 : index
    %162 = vector.load %arg2[%161, %c0_73] : memref<32x128xf32, #tpu.memory_space<vmem>>, vector<1x128xf32>
    %163 = arith.addf %155, %162 : vector<1x128xf32>
    %c2_i32_74 = arith.constant 2 : i32
    %164 = arith.addi %0, %c2_i32_74 : i32
    %c8_i32_75 = arith.constant 8 : i32
    %165 = arith.muli %164, %c8_i32_75 : i32
    %c4_i32_76 = arith.constant 4 : i32
    %166 = arith.addi %165, %c4_i32_76 : i32
    %167 = arith.index_cast %166 : i32 to index
    %168 = memref.load %arg1[%167] : memref<64xi32, #tpu.memory_space<smem>>
    %169 = arith.index_cast %168 : i32 to index
    %c0_77 = arith.constant 0 : index
    %170 = vector.load %arg2[%169, %c0_77] : memref<32x128xf32, #tpu.memory_space<vmem>>, vector<1x128xf32>
    %171 = arith.addf %163, %170 : vector<1x128xf32>
    %c2_i32_78 = arith.constant 2 : i32
    %172 = arith.addi %0, %c2_i32_78 : i32
    %c8_i32_79 = arith.constant 8 : i32
    %173 = arith.muli %172, %c8_i32_79 : i32
    %c5_i32_80 = arith.constant 5 : i32
    %174 = arith.addi %173, %c5_i32_80 : i32
    %175 = arith.index_cast %174 : i32 to index
    %176 = memref.load %arg1[%175] : memref<64xi32, #tpu.memory_space<smem>>
    %177 = arith.index_cast %176 : i32 to index
    %c0_81 = arith.constant 0 : index
    %178 = vector.load %arg2[%177, %c0_81] : memref<32x128xf32, #tpu.memory_space<vmem>>, vector<1x128xf32>
    %179 = arith.addf %171, %178 : vector<1x128xf32>
    %c2_i32_82 = arith.constant 2 : i32
    %180 = arith.addi %0, %c2_i32_82 : i32
    %c8_i32_83 = arith.constant 8 : i32
    %181 = arith.muli %180, %c8_i32_83 : i32
    %c6_i32_84 = arith.constant 6 : i32
    %182 = arith.addi %181, %c6_i32_84 : i32
    %183 = arith.index_cast %182 : i32 to index
    %184 = memref.load %arg1[%183] : memref<64xi32, #tpu.memory_space<smem>>
    %185 = arith.index_cast %184 : i32 to index
    %c0_85 = arith.constant 0 : index
    %186 = vector.load %arg2[%185, %c0_85] : memref<32x128xf32, #tpu.memory_space<vmem>>, vector<1x128xf32>
    %187 = arith.addf %179, %186 : vector<1x128xf32>
    %c2_i32_86 = arith.constant 2 : i32
    %188 = arith.addi %0, %c2_i32_86 : i32
    %c8_i32_87 = arith.constant 8 : i32
    %189 = arith.muli %188, %c8_i32_87 : i32
    %c7_i32_88 = arith.constant 7 : i32
    %190 = arith.addi %189, %c7_i32_88 : i32
    %191 = arith.index_cast %190 : i32 to index
    %192 = memref.load %arg1[%191] : memref<64xi32, #tpu.memory_space<smem>>
    %193 = arith.index_cast %192 : i32 to index
    %c0_89 = arith.constant 0 : index
    %194 = vector.load %arg2[%193, %c0_89] : memref<32x128xf32, #tpu.memory_space<vmem>>, vector<1x128xf32>
    %195 = arith.addf %187, %194 : vector<1x128xf32>
    %c2 = arith.constant 2 : index
    %c0_90 = arith.constant 0 : index
    %196 = vector.load %arg6[%c2, %c0_90] : memref<8x128xf32, #tpu.memory_space<vmem>>, vector<1x128xf32>
    tpu.vector_store %arg6[%c2, %c0_90], %195 {strides = array<i32>} : memref<8x128xf32, #tpu.memory_space<vmem>>, vector<1x128xf32>,
    %c3_i32_91 = arith.constant 3 : i32
    %197 = arith.addi %0, %c3_i32_91 : i32
    %c8_i32_92 = arith.constant 8 : i32
    %198 = arith.muli %197, %c8_i32_92 : i32
    %c0_i32_93 = arith.constant 0 : i32
    %199 = arith.addi %198, %c0_i32_93 : i32
    %200 = arith.index_cast %199 : i32 to index
    %201 = memref.load %arg1[%200] : memref<64xi32, #tpu.memory_space<smem>>
    %202 = arith.index_cast %201 : i32 to index
    %c0_94 = arith.constant 0 : index
    %203 = vector.load %arg2[%202, %c0_94] : memref<32x128xf32, #tpu.memory_space<vmem>>, vector<1x128xf32>
    %204 = arith.addf %1, %203 : vector<1x128xf32>
    %c3_i32_95 = arith.constant 3 : i32
    %205 = arith.addi %0, %c3_i32_95 : i32
    %c8_i32_96 = arith.constant 8 : i32
    %206 = arith.muli %205, %c8_i32_96 : i32
    %c1_i32_97 = arith.constant 1 : i32
    %207 = arith.addi %206, %c1_i32_97 : i32
    %208 = arith.index_cast %207 : i32 to index
    %209 = memref.load %arg1[%208] : memref<64xi32, #tpu.memory_space<smem>>
    %210 = arith.index_cast %209 : i32 to index
    %c0_98 = arith.constant 0 : index
    %211 = vector.load %arg2[%210, %c0_98] : memref<32x128xf32, #tpu.memory_space<vmem>>, vector<1x128xf32>
    %212 = arith.addf %204, %211 : vector<1x128xf32>
    %c3_i32_99 = arith.constant 3 : i32
    %213 = arith.addi %0, %c3_i32_99 : i32
    %c8_i32_100 = arith.constant 8 : i32
    %214 = arith.muli %213, %c8_i32_100 : i32
    %c2_i32_101 = arith.constant 2 : i32
    %215 = arith.addi %214, %c2_i32_101 : i32
    %216 = arith.index_cast %215 : i32 to index
    %217 = memref.load %arg1[%216] : memref<64xi32, #tpu.memory_space<smem>>
    %218 = arith.index_cast %217 : i32 to index
    %c0_102 = arith.constant 0 : index
    %219 = vector.load %arg2[%218, %c0_102] : memref<32x128xf32, #tpu.memory_space<vmem>>, vector<1x128xf32>
    %220 = arith.addf %212, %219 : vector<1x128xf32>
    %c3_i32_103 = arith.constant 3 : i32
    %221 = arith.addi %0, %c3_i32_103 : i32
    %c8_i32_104 = arith.constant 8 : i32
    %222 = arith.muli %221, %c8_i32_104 : i32
    %c3_i32_105 = arith.constant 3 : i32
    %223 = arith.addi %222, %c3_i32_105 : i32
    %224 = arith.index_cast %223 : i32 to index
    %225 = memref.load %arg1[%224] : memref<64xi32, #tpu.memory_space<smem>>
    %226 = arith.index_cast %225 : i32 to index
    %c0_106 = arith.constant 0 : index
    %227 = vector.load %arg2[%226, %c0_106] : memref<32x128xf32, #tpu.memory_space<vmem>>, vector<1x128xf32>
    %228 = arith.addf %220, %227 : vector<1x128xf32>
    %c3_i32_107 = arith.constant 3 : i32
    %229 = arith.addi %0, %c3_i32_107 : i32
    %c8_i32_108 = arith.constant 8 : i32
    %230 = arith.muli %229, %c8_i32_108 : i32
    %c4_i32_109 = arith.constant 4 : i32
    %231 = arith.addi %230, %c4_i32_109 : i32
    %232 = arith.index_cast %231 : i32 to index
    %233 = memref.load %arg1[%232] : memref<64xi32, #tpu.memory_space<smem>>
    %234 = arith.index_cast %233 : i32 to index
    %c0_110 = arith.constant 0 : index
    %235 = vector.load %arg2[%234, %c0_110] : memref<32x128xf32, #tpu.memory_space<vmem>>, vector<1x128xf32>
    %236 = arith.addf %228, %235 : vector<1x128xf32>
    %c3_i32_111 = arith.constant 3 : i32
    %237 = arith.addi %0, %c3_i32_111 : i32
    %c8_i32_112 = arith.constant 8 : i32
    %238 = arith.muli %237, %c8_i32_112 : i32
    %c5_i32_113 = arith.constant 5 : i32
    %239 = arith.addi %238, %c5_i32_113 : i32
    %240 = arith.index_cast %239 : i32 to index
    %241 = memref.load %arg1[%240] : memref<64xi32, #tpu.memory_space<smem>>
    %242 = arith.index_cast %241 : i32 to index
    %c0_114 = arith.constant 0 : index
    %243 = vector.load %arg2[%242, %c0_114] : memref<32x128xf32, #tpu.memory_space<vmem>>, vector<1x128xf32>
    %244 = arith.addf %236, %243 : vector<1x128xf32>
    %c3_i32_115 = arith.constant 3 : i32
    %245 = arith.addi %0, %c3_i32_115 : i32
    %c8_i32_116 = arith.constant 8 : i32
    %246 = arith.muli %245, %c8_i32_116 : i32
    %c6_i32_117 = arith.constant 6 : i32
    %247 = arith.addi %246, %c6_i32_117 : i32
    %248 = arith.index_cast %247 : i32 to index
    %249 = memref.load %arg1[%248] : memref<64xi32, #tpu.memory_space<smem>>
    %250 = arith.index_cast %249 : i32 to index
    %c0_118 = arith.constant 0 : index
    %251 = vector.load %arg2[%250, %c0_118] : memref<32x128xf32, #tpu.memory_space<vmem>>, vector<1x128xf32>
    %252 = arith.addf %244, %251 : vector<1x128xf32>
    %c3_i32_119 = arith.constant 3 : i32
    %253 = arith.addi %0, %c3_i32_119 : i32
    %c8_i32_120 = arith.constant 8 : i32
    %254 = arith.muli %253, %c8_i32_120 : i32
    %c7_i32_121 = arith.constant 7 : i32
    %255 = arith.addi %254, %c7_i32_121 : i32
    %256 = arith.index_cast %255 : i32 to index
    %257 = memref.load %arg1[%256] : memref<64xi32, #tpu.memory_space<smem>>
    %258 = arith.index_cast %257 : i32 to index
    %c0_122 = arith.constant 0 : index
    %259 = vector.load %arg2[%258, %c0_122] : memref<32x128xf32, #tpu.memory_space<vmem>>, vector<1x128xf32>
    %260 = arith.addf %252, %259 : vector<1x128xf32>
    %c3 = arith.constant 3 : index
    %c0_123 = arith.constant 0 : index
    %261 = vector.load %arg6[%c3, %c0_123] : memref<8x128xf32, #tpu.memory_space<vmem>>, vector<1x128xf32>
    tpu.vector_store %arg6[%c3, %c0_123], %260 {strides = array<i32>} : memref<8x128xf32, #tpu.memory_space<vmem>>, vector<1x128xf32>,
    %c4_i32_124 = arith.constant 4 : i32
    %262 = arith.addi %0, %c4_i32_124 : i32
    %c8_i32_125 = arith.constant 8 : i32
    %263 = arith.muli %262, %c8_i32_125 : i32
    %c0_i32_126 = arith.constant 0 : i32
    %264 = arith.addi %263, %c0_i32_126 : i32
    %265 = arith.index_cast %264 : i32 to index
    %266 = memref.load %arg1[%265] : memref<64xi32, #tpu.memory_space<smem>>
    %267 = arith.index_cast %266 : i32 to index
    %c0_127 = arith.constant 0 : index
    %268 = vector.load %arg2[%267, %c0_127] : memref<32x128xf32, #tpu.memory_space<vmem>>, vector<1x128xf32>
    %269 = arith.addf %1, %268 : vector<1x128xf32>
    %c4_i32_128 = arith.constant 4 : i32
    %270 = arith.addi %0, %c4_i32_128 : i32
    %c8_i32_129 = arith.constant 8 : i32
    %271 = arith.muli %270, %c8_i32_129 : i32
    %c1_i32_130 = arith.constant 1 : i32
    %272 = arith.addi %271, %c1_i32_130 : i32
    %273 = arith.index_cast %272 : i32 to index
    %274 = memref.load %arg1[%273] : memref<64xi32, #tpu.memory_space<smem>>
    %275 = arith.index_cast %274 : i32 to index
    %c0_131 = arith.constant 0 : index
    %276 = vector.load %arg2[%275, %c0_131] : memref<32x128xf32, #tpu.memory_space<vmem>>, vector<1x128xf32>
    %277 = arith.addf %269, %276 : vector<1x128xf32>
    %c4_i32_132 = arith.constant 4 : i32
    %278 = arith.addi %0, %c4_i32_132 : i32
    %c8_i32_133 = arith.constant 8 : i32
    %279 = arith.muli %278, %c8_i32_133 : i32
    %c2_i32_134 = arith.constant 2 : i32
    %280 = arith.addi %279, %c2_i32_134 : i32
    %281 = arith.index_cast %280 : i32 to index
    %282 = memref.load %arg1[%281] : memref<64xi32, #tpu.memory_space<smem>>
    %283 = arith.index_cast %282 : i32 to index
    %c0_135 = arith.constant 0 : index
    %284 = vector.load %arg2[%283, %c0_135] : memref<32x128xf32, #tpu.memory_space<vmem>>, vector<1x128xf32>
    %285 = arith.addf %277, %284 : vector<1x128xf32>
    %c4_i32_136 = arith.constant 4 : i32
    %286 = arith.addi %0, %c4_i32_136 : i32
    %c8_i32_137 = arith.constant 8 : i32
    %287 = arith.muli %286, %c8_i32_137 : i32
    %c3_i32_138 = arith.constant 3 : i32
    %288 = arith.addi %287, %c3_i32_138 : i32
    %289 = arith.index_cast %288 : i32 to index
    %290 = memref.load %arg1[%289] : memref<64xi32, #tpu.memory_space<smem>>
    %291 = arith.index_cast %290 : i32 to index
    %c0_139 = arith.constant 0 : index
    %292 = vector.load %arg2[%291, %c0_139] : memref<32x128xf32, #tpu.memory_space<vmem>>, vector<1x128xf32>
    %293 = arith.addf %285, %292 : vector<1x128xf32>
    %c4_i32_140 = arith.constant 4 : i32
    %294 = arith.addi %0, %c4_i32_140 : i32
    %c8_i32_141 = arith.constant 8 : i32
    %295 = arith.muli %294, %c8_i32_141 : i32
    %c4_i32_142 = arith.constant 4 : i32
    %296 = arith.addi %295, %c4_i32_142 : i32
    %297 = arith.index_cast %296 : i32 to index
    %298 = memref.load %arg1[%297] : memref<64xi32, #tpu.memory_space<smem>>
    %299 = arith.index_cast %298 : i32 to index
    %c0_143 = arith.constant 0 : index
    %300 = vector.load %arg2[%299, %c0_143] : memref<32x128xf32, #tpu.memory_space<vmem>>, vector<1x128xf32>
    %301 = arith.addf %293, %300 : vector<1x128xf32>
    %c4_i32_144 = arith.constant 4 : i32
    %302 = arith.addi %0, %c4_i32_144 : i32
    %c8_i32_145 = arith.constant 8 : i32
    %303 = arith.muli %302, %c8_i32_145 : i32
    %c5_i32_146 = arith.constant 5 : i32
    %304 = arith.addi %303, %c5_i32_146 : i32
    %305 = arith.index_cast %304 : i32 to index
    %306 = memref.load %arg1[%305] : memref<64xi32, #tpu.memory_space<smem>>
    %307 = arith.index_cast %306 : i32 to index
    %c0_147 = arith.constant 0 : index
    %308 = vector.load %arg2[%307, %c0_147] : memref<32x128xf32, #tpu.memory_space<vmem>>, vector<1x128xf32>
    %309 = arith.addf %301, %308 : vector<1x128xf32>
    %c4_i32_148 = arith.constant 4 : i32
    %310 = arith.addi %0, %c4_i32_148 : i32
    %c8_i32_149 = arith.constant 8 : i32
    %311 = arith.muli %310, %c8_i32_149 : i32
    %c6_i32_150 = arith.constant 6 : i32
    %312 = arith.addi %311, %c6_i32_150 : i32
    %313 = arith.index_cast %312 : i32 to index
    %314 = memref.load %arg1[%313] : memref<64xi32, #tpu.memory_space<smem>>
    %315 = arith.index_cast %314 : i32 to index
    %c0_151 = arith.constant 0 : index
    %316 = vector.load %arg2[%315, %c0_151] : memref<32x128xf32, #tpu.memory_space<vmem>>, vector<1x128xf32>
    %317 = arith.addf %309, %316 : vector<1x128xf32>
    %c4_i32_152 = arith.constant 4 : i32
    %318 = arith.addi %0, %c4_i32_152 : i32
    %c8_i32_153 = arith.constant 8 : i32
    %319 = arith.muli %318, %c8_i32_153 : i32
    %c7_i32_154 = arith.constant 7 : i32
    %320 = arith.addi %319, %c7_i32_154 : i32
    %321 = arith.index_cast %320 : i32 to index
    %322 = memref.load %arg1[%321] : memref<64xi32, #tpu.memory_space<smem>>
    %323 = arith.index_cast %322 : i32 to index
    %c0_155 = arith.constant 0 : index
    %324 = vector.load %arg2[%323, %c0_155] : memref<32x128xf32, #tpu.memory_space<vmem>>, vector<1x128xf32>
    %325 = arith.addf %317, %324 : vector<1x128xf32>
    %c4 = arith.constant 4 : index
    %c0_156 = arith.constant 0 : index
    %326 = vector.load %arg6[%c4, %c0_156] : memref<8x128xf32, #tpu.memory_space<vmem>>, vector<1x128xf32>
    tpu.vector_store %arg6[%c4, %c0_156], %325 {strides = array<i32>} : memref<8x128xf32, #tpu.memory_space<vmem>>, vector<1x128xf32>,
    %c5_i32_157 = arith.constant 5 : i32
    %327 = arith.addi %0, %c5_i32_157 : i32
    %c8_i32_158 = arith.constant 8 : i32
    %328 = arith.muli %327, %c8_i32_158 : i32
    %c0_i32_159 = arith.constant 0 : i32
    %329 = arith.addi %328, %c0_i32_159 : i32
    %330 = arith.index_cast %329 : i32 to index
    %331 = memref.load %arg1[%330] : memref<64xi32, #tpu.memory_space<smem>>
    %332 = arith.index_cast %331 : i32 to index
    %c0_160 = arith.constant 0 : index
    %333 = vector.load %arg2[%332, %c0_160] : memref<32x128xf32, #tpu.memory_space<vmem>>, vector<1x128xf32>
    %334 = arith.addf %1, %333 : vector<1x128xf32>
    %c5_i32_161 = arith.constant 5 : i32
    %335 = arith.addi %0, %c5_i32_161 : i32
    %c8_i32_162 = arith.constant 8 : i32
    %336 = arith.muli %335, %c8_i32_162 : i32
    %c1_i32_163 = arith.constant 1 : i32
    %337 = arith.addi %336, %c1_i32_163 : i32
    %338 = arith.index_cast %337 : i32 to index
    %339 = memref.load %arg1[%338] : memref<64xi32, #tpu.memory_space<smem>>
    %340 = arith.index_cast %339 : i32 to index
    %c0_164 = arith.constant 0 : index
    %341 = vector.load %arg2[%340, %c0_164] : memref<32x128xf32, #tpu.memory_space<vmem>>, vector<1x128xf32>
    %342 = arith.addf %334, %341 : vector<1x128xf32>
    %c5_i32_165 = arith.constant 5 : i32
    %343 = arith.addi %0, %c5_i32_165 : i32
    %c8_i32_166 = arith.constant 8 : i32
    %344 = arith.muli %343, %c8_i32_166 : i32
    %c2_i32_167 = arith.constant 2 : i32
    %345 = arith.addi %344, %c2_i32_167 : i32
    %346 = arith.index_cast %345 : i32 to index
    %347 = memref.load %arg1[%346] : memref<64xi32, #tpu.memory_space<smem>>
    %348 = arith.index_cast %347 : i32 to index
    %c0_168 = arith.constant 0 : index
    %349 = vector.load %arg2[%348, %c0_168] : memref<32x128xf32, #tpu.memory_space<vmem>>, vector<1x128xf32>
    %350 = arith.addf %342, %349 : vector<1x128xf32>
    %c5_i32_169 = arith.constant 5 : i32
    %351 = arith.addi %0, %c5_i32_169 : i32
    %c8_i32_170 = arith.constant 8 : i32
    %352 = arith.muli %351, %c8_i32_170 : i32
    %c3_i32_171 = arith.constant 3 : i32
    %353 = arith.addi %352, %c3_i32_171 : i32
    %354 = arith.index_cast %353 : i32 to index
    %355 = memref.load %arg1[%354] : memref<64xi32, #tpu.memory_space<smem>>
    %356 = arith.index_cast %355 : i32 to index
    %c0_172 = arith.constant 0 : index
    %357 = vector.load %arg2[%356, %c0_172] : memref<32x128xf32, #tpu.memory_space<vmem>>, vector<1x128xf32>
    %358 = arith.addf %350, %357 : vector<1x128xf32>
    %c5_i32_173 = arith.constant 5 : i32
    %359 = arith.addi %0, %c5_i32_173 : i32
    %c8_i32_174 = arith.constant 8 : i32
    %360 = arith.muli %359, %c8_i32_174 : i32
    %c4_i32_175 = arith.constant 4 : i32
    %361 = arith.addi %360, %c4_i32_175 : i32
    %362 = arith.index_cast %361 : i32 to index
    %363 = memref.load %arg1[%362] : memref<64xi32, #tpu.memory_space<smem>>
    %364 = arith.index_cast %363 : i32 to index
    %c0_176 = arith.constant 0 : index
    %365 = vector.load %arg2[%364, %c0_176] : memref<32x128xf32, #tpu.memory_space<vmem>>, vector<1x128xf32>
    %366 = arith.addf %358, %365 : vector<1x128xf32>
    %c5_i32_177 = arith.constant 5 : i32
    %367 = arith.addi %0, %c5_i32_177 : i32
    %c8_i32_178 = arith.constant 8 : i32
    %368 = arith.muli %367, %c8_i32_178 : i32
    %c5_i32_179 = arith.constant 5 : i32
    %369 = arith.addi %368, %c5_i32_179 : i32
    %370 = arith.index_cast %369 : i32 to index
    %371 = memref.load %arg1[%370] : memref<64xi32, #tpu.memory_space<smem>>
    %372 = arith.index_cast %371 : i32 to index
    %c0_180 = arith.constant 0 : index
    %373 = vector.load %arg2[%372, %c0_180] : memref<32x128xf32, #tpu.memory_space<vmem>>, vector<1x128xf32>
    %374 = arith.addf %366, %373 : vector<1x128xf32>
    %c5_i32_181 = arith.constant 5 : i32
    %375 = arith.addi %0, %c5_i32_181 : i32
    %c8_i32_182 = arith.constant 8 : i32
    %376 = arith.muli %375, %c8_i32_182 : i32
    %c6_i32_183 = arith.constant 6 : i32
    %377 = arith.addi %376, %c6_i32_183 : i32
    %378 = arith.index_cast %377 : i32 to index
    %379 = memref.load %arg1[%378] : memref<64xi32, #tpu.memory_space<smem>>
    %380 = arith.index_cast %379 : i32 to index
    %c0_184 = arith.constant 0 : index
    %381 = vector.load %arg2[%380, %c0_184] : memref<32x128xf32, #tpu.memory_space<vmem>>, vector<1x128xf32>
    %382 = arith.addf %374, %381 : vector<1x128xf32>
    %c5_i32_185 = arith.constant 5 : i32
    %383 = arith.addi %0, %c5_i32_185 : i32
    %c8_i32_186 = arith.constant 8 : i32
    %384 = arith.muli %383, %c8_i32_186 : i32
    %c7_i32_187 = arith.constant 7 : i32
    %385 = arith.addi %384, %c7_i32_187 : i32
    %386 = arith.index_cast %385 : i32 to index
    %387 = memref.load %arg1[%386] : memref<64xi32, #tpu.memory_space<smem>>
    %388 = arith.index_cast %387 : i32 to index
    %c0_188 = arith.constant 0 : index
    %389 = vector.load %arg2[%388, %c0_188] : memref<32x128xf32, #tpu.memory_space<vmem>>, vector<1x128xf32>
    %390 = arith.addf %382, %389 : vector<1x128xf32>
    %c5 = arith.constant 5 : index
    %c0_189 = arith.constant 0 : index
    %391 = vector.load %arg6[%c5, %c0_189] : memref<8x128xf32, #tpu.memory_space<vmem>>, vector<1x128xf32>
    tpu.vector_store %arg6[%c5, %c0_189], %390 {strides = array<i32>} : memref<8x128xf32, #tpu.memory_space<vmem>>, vector<1x128xf32>,
    %c6_i32_190 = arith.constant 6 : i32
    %392 = arith.addi %0, %c6_i32_190 : i32
    %c8_i32_191 = arith.constant 8 : i32
    %393 = arith.muli %392, %c8_i32_191 : i32
    %c0_i32_192 = arith.constant 0 : i32
    %394 = arith.addi %393, %c0_i32_192 : i32
    %395 = arith.index_cast %394 : i32 to index
    %396 = memref.load %arg1[%395] : memref<64xi32, #tpu.memory_space<smem>>
    %397 = arith.index_cast %396 : i32 to index
    %c0_193 = arith.constant 0 : index
    %398 = vector.load %arg2[%397, %c0_193] : memref<32x128xf32, #tpu.memory_space<vmem>>, vector<1x128xf32>
    %399 = arith.addf %1, %398 : vector<1x128xf32>
    %c6_i32_194 = arith.constant 6 : i32
    %400 = arith.addi %0, %c6_i32_194 : i32
    %c8_i32_195 = arith.constant 8 : i32
    %401 = arith.muli %400, %c8_i32_195 : i32
    %c1_i32_196 = arith.constant 1 : i32
    %402 = arith.addi %401, %c1_i32_196 : i32
    %403 = arith.index_cast %402 : i32 to index
    %404 = memref.load %arg1[%403] : memref<64xi32, #tpu.memory_space<smem>>
    %405 = arith.index_cast %404 : i32 to index
    %c0_197 = arith.constant 0 : index
    %406 = vector.load %arg2[%405, %c0_197] : memref<32x128xf32, #tpu.memory_space<vmem>>, vector<1x128xf32>
    %407 = arith.addf %399, %406 : vector<1x128xf32>
    %c6_i32_198 = arith.constant 6 : i32
    %408 = arith.addi %0, %c6_i32_198 : i32
    %c8_i32_199 = arith.constant 8 : i32
    %409 = arith.muli %408, %c8_i32_199 : i32
    %c2_i32_200 = arith.constant 2 : i32
    %410 = arith.addi %409, %c2_i32_200 : i32
    %411 = arith.index_cast %410 : i32 to index
    %412 = memref.load %arg1[%411] : memref<64xi32, #tpu.memory_space<smem>>
    %413 = arith.index_cast %412 : i32 to index
    %c0_201 = arith.constant 0 : index
    %414 = vector.load %arg2[%413, %c0_201] : memref<32x128xf32, #tpu.memory_space<vmem>>, vector<1x128xf32>
    %415 = arith.addf %407, %414 : vector<1x128xf32>
    %c6_i32_202 = arith.constant 6 : i32
    %416 = arith.addi %0, %c6_i32_202 : i32
    %c8_i32_203 = arith.constant 8 : i32
    %417 = arith.muli %416, %c8_i32_203 : i32
    %c3_i32_204 = arith.constant 3 : i32
    %418 = arith.addi %417, %c3_i32_204 : i32
    %419 = arith.index_cast %418 : i32 to index
    %420 = memref.load %arg1[%419] : memref<64xi32, #tpu.memory_space<smem>>
    %421 = arith.index_cast %420 : i32 to index
    %c0_205 = arith.constant 0 : index
    %422 = vector.load %arg2[%421, %c0_205] : memref<32x128xf32, #tpu.memory_space<vmem>>, vector<1x128xf32>
    %423 = arith.addf %415, %422 : vector<1x128xf32>
    %c6_i32_206 = arith.constant 6 : i32
    %424 = arith.addi %0, %c6_i32_206 : i32
    %c8_i32_207 = arith.constant 8 : i32
    %425 = arith.muli %424, %c8_i32_207 : i32
    %c4_i32_208 = arith.constant 4 : i32
    %426 = arith.addi %425, %c4_i32_208 : i32
    %427 = arith.index_cast %426 : i32 to index
    %428 = memref.load %arg1[%427] : memref<64xi32, #tpu.memory_space<smem>>
    %429 = arith.index_cast %428 : i32 to index
    %c0_209 = arith.constant 0 : index
    %430 = vector.load %arg2[%429, %c0_209] : memref<32x128xf32, #tpu.memory_space<vmem>>, vector<1x128xf32>
    %431 = arith.addf %423, %430 : vector<1x128xf32>
    %c6_i32_210 = arith.constant 6 : i32
    %432 = arith.addi %0, %c6_i32_210 : i32
    %c8_i32_211 = arith.constant 8 : i32
    %433 = arith.muli %432, %c8_i32_211 : i32
    %c5_i32_212 = arith.constant 5 : i32
    %434 = arith.addi %433, %c5_i32_212 : i32
    %435 = arith.index_cast %434 : i32 to index
    %436 = memref.load %arg1[%435] : memref<64xi32, #tpu.memory_space<smem>>
    %437 = arith.index_cast %436 : i32 to index
    %c0_213 = arith.constant 0 : index
    %438 = vector.load %arg2[%437, %c0_213] : memref<32x128xf32, #tpu.memory_space<vmem>>, vector<1x128xf32>
    %439 = arith.addf %431, %438 : vector<1x128xf32>
    %c6_i32_214 = arith.constant 6 : i32
    %440 = arith.addi %0, %c6_i32_214 : i32
    %c8_i32_215 = arith.constant 8 : i32
    %441 = arith.muli %440, %c8_i32_215 : i32
    %c6_i32_216 = arith.constant 6 : i32
    %442 = arith.addi %441, %c6_i32_216 : i32
    %443 = arith.index_cast %442 : i32 to index
    %444 = memref.load %arg1[%443] : memref<64xi32, #tpu.memory_space<smem>>
    %445 = arith.index_cast %444 : i32 to index
    %c0_217 = arith.constant 0 : index
    %446 = vector.load %arg2[%445, %c0_217] : memref<32x128xf32, #tpu.memory_space<vmem>>, vector<1x128xf32>
    %447 = arith.addf %439, %446 : vector<1x128xf32>
    %c6_i32_218 = arith.constant 6 : i32
    %448 = arith.addi %0, %c6_i32_218 : i32
    %c8_i32_219 = arith.constant 8 : i32
    %449 = arith.muli %448, %c8_i32_219 : i32
    %c7_i32_220 = arith.constant 7 : i32
    %450 = arith.addi %449, %c7_i32_220 : i32
    %451 = arith.index_cast %450 : i32 to index
    %452 = memref.load %arg1[%451] : memref<64xi32, #tpu.memory_space<smem>>
    %453 = arith.index_cast %452 : i32 to index
    %c0_221 = arith.constant 0 : index
    %454 = vector.load %arg2[%453, %c0_221] : memref<32x128xf32, #tpu.memory_space<vmem>>, vector<1x128xf32>
    %455 = arith.addf %447, %454 : vector<1x128xf32>
    %c6 = arith.constant 6 : index
    %c0_222 = arith.constant 0 : index
    %456 = vector.load %arg6[%c6, %c0_222] : memref<8x128xf32, #tpu.memory_space<vmem>>, vector<1x128xf32>
    tpu.vector_store %arg6[%c6, %c0_222], %455 {strides = array<i32>} : memref<8x128xf32, #tpu.memory_space<vmem>>, vector<1x128xf32>,
    %c7_i32_223 = arith.constant 7 : i32
    %457 = arith.addi %0, %c7_i32_223 : i32
    %c8_i32_224 = arith.constant 8 : i32
    %458 = arith.muli %457, %c8_i32_224 : i32
    %c0_i32_225 = arith.constant 0 : i32
    %459 = arith.addi %458, %c0_i32_225 : i32
    %460 = arith.index_cast %459 : i32 to index
    %461 = memref.load %arg1[%460] : memref<64xi32, #tpu.memory_space<smem>>
    %462 = arith.index_cast %461 : i32 to index
    %c0_226 = arith.constant 0 : index
    %463 = vector.load %arg2[%462, %c0_226] : memref<32x128xf32, #tpu.memory_space<vmem>>, vector<1x128xf32>
    %464 = arith.addf %1, %463 : vector<1x128xf32>
    %c7_i32_227 = arith.constant 7 : i32
    %465 = arith.addi %0, %c7_i32_227 : i32
    %c8_i32_228 = arith.constant 8 : i32
    %466 = arith.muli %465, %c8_i32_228 : i32
    %c1_i32_229 = arith.constant 1 : i32
    %467 = arith.addi %466, %c1_i32_229 : i32
    %468 = arith.index_cast %467 : i32 to index
    %469 = memref.load %arg1[%468] : memref<64xi32, #tpu.memory_space<smem>>
    %470 = arith.index_cast %469 : i32 to index
    %c0_230 = arith.constant 0 : index
    %471 = vector.load %arg2[%470, %c0_230] : memref<32x128xf32, #tpu.memory_space<vmem>>, vector<1x128xf32>
    %472 = arith.addf %464, %471 : vector<1x128xf32>
    %c7_i32_231 = arith.constant 7 : i32
    %473 = arith.addi %0, %c7_i32_231 : i32
    %c8_i32_232 = arith.constant 8 : i32
    %474 = arith.muli %473, %c8_i32_232 : i32
    %c2_i32_233 = arith.constant 2 : i32
    %475 = arith.addi %474, %c2_i32_233 : i32
    %476 = arith.index_cast %475 : i32 to index
    %477 = memref.load %arg1[%476] : memref<64xi32, #tpu.memory_space<smem>>
    %478 = arith.index_cast %477 : i32 to index
    %c0_234 = arith.constant 0 : index
    %479 = vector.load %arg2[%478, %c0_234] : memref<32x128xf32, #tpu.memory_space<vmem>>, vector<1x128xf32>
    %480 = arith.addf %472, %479 : vector<1x128xf32>
    %c7_i32_235 = arith.constant 7 : i32
    %481 = arith.addi %0, %c7_i32_235 : i32
    %c8_i32_236 = arith.constant 8 : i32
    %482 = arith.muli %481, %c8_i32_236 : i32
    %c3_i32_237 = arith.constant 3 : i32
    %483 = arith.addi %482, %c3_i32_237 : i32
    %484 = arith.index_cast %483 : i32 to index
    %485 = memref.load %arg1[%484] : memref<64xi32, #tpu.memory_space<smem>>
    %486 = arith.index_cast %485 : i32 to index
    %c0_238 = arith.constant 0 : index
    %487 = vector.load %arg2[%486, %c0_238] : memref<32x128xf32, #tpu.memory_space<vmem>>, vector<1x128xf32>
    %488 = arith.addf %480, %487 : vector<1x128xf32>
    %c7_i32_239 = arith.constant 7 : i32
    %489 = arith.addi %0, %c7_i32_239 : i32
    %c8_i32_240 = arith.constant 8 : i32
    %490 = arith.muli %489, %c8_i32_240 : i32
    %c4_i32_241 = arith.constant 4 : i32
    %491 = arith.addi %490, %c4_i32_241 : i32
    %492 = arith.index_cast %491 : i32 to index
    %493 = memref.load %arg1[%492] : memref<64xi32, #tpu.memory_space<smem>>
    %494 = arith.index_cast %493 : i32 to index
    %c0_242 = arith.constant 0 : index
    %495 = vector.load %arg2[%494, %c0_242] : memref<32x128xf32, #tpu.memory_space<vmem>>, vector<1x128xf32>
    %496 = arith.addf %488, %495 : vector<1x128xf32>
    %c7_i32_243 = arith.constant 7 : i32
    %497 = arith.addi %0, %c7_i32_243 : i32
    %c8_i32_244 = arith.constant 8 : i32
    %498 = arith.muli %497, %c8_i32_244 : i32
    %c5_i32_245 = arith.constant 5 : i32
    %499 = arith.addi %498, %c5_i32_245 : i32
    %500 = arith.index_cast %499 : i32 to index
    %501 = memref.load %arg1[%500] : memref<64xi32, #tpu.memory_space<smem>>
    %502 = arith.index_cast %501 : i32 to index
    %c0_246 = arith.constant 0 : index
    %503 = vector.load %arg2[%502, %c0_246] : memref<32x128xf32, #tpu.memory_space<vmem>>, vector<1x128xf32>
    %504 = arith.addf %496, %503 : vector<1x128xf32>
    %c7_i32_247 = arith.constant 7 : i32
    %505 = arith.addi %0, %c7_i32_247 : i32
    %c8_i32_248 = arith.constant 8 : i32
    %506 = arith.muli %505, %c8_i32_248 : i32
    %c6_i32_249 = arith.constant 6 : i32
    %507 = arith.addi %506, %c6_i32_249 : i32
    %508 = arith.index_cast %507 : i32 to index
    %509 = memref.load %arg1[%508] : memref<64xi32, #tpu.memory_space<smem>>
    %510 = arith.index_cast %509 : i32 to index
    %c0_250 = arith.constant 0 : index
    %511 = vector.load %arg2[%510, %c0_250] : memref<32x128xf32, #tpu.memory_space<vmem>>, vector<1x128xf32>
    %512 = arith.addf %504, %511 : vector<1x128xf32>
    %c7_i32_251 = arith.constant 7 : i32
    %513 = arith.addi %0, %c7_i32_251 : i32
    %c8_i32_252 = arith.constant 8 : i32
    %514 = arith.muli %513, %c8_i32_252 : i32
    %c7_i32_253 = arith.constant 7 : i32
    %515 = arith.addi %514, %c7_i32_253 : i32
    %516 = arith.index_cast %515 : i32 to index
    %517 = memref.load %arg1[%516] : memref<64xi32, #tpu.memory_space<smem>>
    %518 = arith.index_cast %517 : i32 to index
    %c0_254 = arith.constant 0 : index
    %519 = vector.load %arg2[%518, %c0_254] : memref<32x128xf32, #tpu.memory_space<vmem>>, vector<1x128xf32>
    %520 = arith.addf %512, %519 : vector<1x128xf32>
    %c7 = arith.constant 7 : index
    %c0_255 = arith.constant 0 : index
    %521 = vector.load %arg6[%c7, %c0_255] : memref<8x128xf32, #tpu.memory_space<vmem>>, vector<1x128xf32>
    tpu.vector_store %arg6[%c7, %c0_255], %520 {strides = array<i32>} : memref<8x128xf32, #tpu.memory_space<vmem>>, vector<1x128xf32>,
    %c0_256 = arith.constant 0 : index
    %c0_257 = arith.constant 0 : index
    %522 = vector.load %arg6[%c0_256, %c0_257] : memref<8x128xf32, #tpu.memory_space<vmem>>, vector<8x128xf32>
    %c0_258 = arith.constant 0 : index
    %c0_259 = arith.constant 0 : index
    %523 = vector.load %arg3[%c0_258, %c0_259] : memref<128x128xf32, #tpu.memory_space<vmem>>, vector<128x128xf32>
    %cst_260 = arith.constant dense<0.000000e+00> : vector<8x128xf32>
    %524 = tpu.matmul %522, %523, %cst_260 {dimension_numbers = #tpu.dot_dimension_numbers<[1], [0], [0], [1], [0, 0, 1, 1], [], []>} : vector<8x128xf32>, vector<128x128xf32>, vector<8x128xf32> -> vector<8x128xf32>
    %c0_261 = arith.constant 0 : index
    %c0_262 = arith.constant 0 : index
    %525 = vector.load %arg4[%c0_261, %c0_262] : memref<1x128xf32, #tpu.memory_space<vmem>>, vector<1x128xf32>
    %526 = vector.broadcast %525 : vector<1x128xf32> to vector<8x128xf32>
    %527 = arith.addf %524, %526 : vector<8x128xf32>
    %cst_263 = arith.constant dense<0xFF800000> : vector<8xf32>
    %528 = vector.multi_reduction <maximumf>, %527, %cst_263 [1] : vector<8x128xf32> to vector<8xf32>
    %529 = vector.shape_cast %528 : vector<8xf32> to vector<8x1xf32>
    %530 = vector.broadcast %529 : vector<8x1xf32> to vector<8x128xf32>
    %531 = arith.subf %527, %530 : vector<8x128xf32>
    %532 = math.exp %531 : vector<8x128xf32>
    %cst_264 = arith.constant dense<0.000000e+00> : vector<8xf32>
    %533 = vector.multi_reduction <add>, %532, %cst_264 [1] : vector<8x128xf32> to vector<8xf32>
    %534 = vector.shape_cast %533 : vector<8xf32> to vector<8x1xf32>
    %535 = math.log %534 : vector<8x1xf32>
    %536 = vector.broadcast %535 : vector<8x1xf32> to vector<8x128xf32>
    %537 = arith.subf %531, %536 : vector<8x128xf32>
    %c0_265 = arith.constant 0 : index
    %c0_266 = arith.constant 0 : index
    %538 = vector.load %arg5[%c0_265, %c0_266] : memref<8x128xf32, #tpu.memory_space<vmem>>, vector<8x128xf32>
    tpu.vector_store %arg5[%c0_265, %c0_266], %537 {strides = array<i32>} : memref<8x128xf32, #tpu.memory_space<vmem>>, vector<8x128xf32>,
    return
  }
  func.func @transform_0(%arg0: i32, %arg1: memref<64xi32, #tpu.memory_space<smem>>) -> (i32, i32) {
    %c0_i32 = arith.constant 0 : i32
    %c0_i32_0 = arith.constant 0 : i32
    %c0_i32_1 = arith.constant 0 : i32
    return %c0_i32, %c0_i32_0 : i32, i32
  }
  func.func @transform_1(%arg0: i32, %arg1: memref<64xi32, #tpu.memory_space<smem>>) -> (i32, i32) {
    %c0_i32 = arith.constant 0 : i32
    %c0_i32_0 = arith.constant 0 : i32
    %c0_i32_1 = arith.constant 0 : i32
    return %c0_i32, %c0_i32_0 : i32, i32
  }
  func.func @transform_2(%arg0: i32, %arg1: memref<64xi32, #tpu.memory_space<smem>>) -> (i32, i32) {
    %c0_i32 = arith.constant 0 : i32
    %c0_i32_0 = arith.constant 0 : i32
    %c0_i32_1 = arith.constant 0 : i32
    return %c0_i32, %c0_i32_0 : i32, i32
  }
  func.func @transform_3(%arg0: i32, %arg1: memref<64xi32, #tpu.memory_space<smem>>) -> (i32, i32) {
    %c0_i32 = arith.constant 0 : i32
    %c0_i32_0 = arith.constant 0 : i32
    return %arg0, %c0_i32 : i32, i32
  }
}

</mosaic_0001>

<bundles_post_ra>
// kernel: tpu_custom_call.1
= control target key start
LH: loop header
LB: loop body
LE: loop exit
PB: predicated region body
PF: predicated region fallthrough
CT: control target
= control target key end

     0   :  { %s692_s18 = smov [#allocation4]   ;;  %s834_s0 = inlined_call_operand.hbm [shape: s32[64], index: 0, kind: input, shape index: {}]   ;;  %s835_s1 = inlined_call_operand.hbm [shape: f32[32,128], index: 1, kind: input, shape index: {}]   ;;  %s836_s2 = inlined_call_operand.hbm [shape: f32[128,128], index: 2, kind: input, shape index: {}]   ;;  %s837_s3 = inlined_call_operand.vmem [shape: f32[1,128], index: 3, kind: input, shape index: {}]   ;;  %s838_s4 = inlined_call_operand.hbm [shape: f32[8,128], index: 4, kind: output, shape index: {}]  }
   0x1   :  { %s10_s17 = sshll.u32 %s834_s0, 4  ;;  %s11_s17 = int_to_ptr.hbm [resolvable:$true] %s10_s17 }
   0x2   :  { %13 = dma.hbm_to_smem %s11_s17, 16, %s692_s18, [#allocation3] }
   0x3   :  { %684 = dma.done.wait [#allocation3], 16 }
   0x4   :  { %685 = vsyncadd [#allocation3], 4294967280 }
   0x5   :  { %16 = sfence }
   0x6   :  { %17 = vsyncpa [#allocation6], 0 }
   0x7   :  { %18 = vsyncpa [#allocation9], 0 }
   0x8   :  { %19 = vsyncpa [#allocation7], 0  ;;  %s24_s21 = sshll.u32 %s835_s1, 4  ;;  %s693_s22 = smov [#allocation5]   ;;  %s25_s21 = int_to_ptr.hbm [resolvable:$true] %s24_s21 }
   0x9   :  { %s26_s23 = sshll.u32 %s693_s22, 4  ;;  %s37_s0 = sshll.u32 %s836_s2, 4  ;;  %s27_s23 = int_to_ptr.vmem [resolvable:$true] %s26_s23  ;;  %s38_s0 = int_to_ptr.hbm [resolvable:$true] %s37_s0 }
   0xa   :  { %s694_s26 = smov 128   ;;  %s695_s27 = smov 8  }
   0xb   :  { %32 = dma.hbm_to_vmem [thread:$0]  %s25_s21, 512, %s27_s23, [#allocation6], %s694_s26, %s694_s26, %s695_s27  }
   0xc   :  { %s696_s28 = smov [#allocation8]  }
   0xd   :  { %s39_s29 = sshll.u32 %s696_s28, 4  ;;  %s40_s29 = int_to_ptr.vmem [resolvable:$true] %s39_s29 }
   0xe   :  { %45 = dma.hbm_to_vmem [thread:$0]  %s38_s0, 2048, %s40_s29, [#allocation9], %s694_s26, %s694_s26, %s695_s27  }
   0xf   :  { %686 = dma.done.wait [#allocation6], 512  }
  0x10   :  { %687 = vsyncadd [#allocation6], 4294966784 }
  0x11   :  { %688 = dma.done.wait [#allocation9], 2048  }
  0x12   :  { %689 = vsyncadd [#allocation9], 4294965248  ;;  %s58_s1 = sld [smem:[#allocation4]]  ;;  %v408_v0 = vld [vmem:[#allocation8 + $0x78] sm:$0xff]  ;;  %v407_v1 = vld [vmem:[#allocation8 + $0x70] sm:$0xff] }
  0x13   :  { %s526_s30 = sld [smem:[#allocation4 + $0x1]]  ;;  %413 = vmatpush.msra.mxu0 %v408_v0  ;;  %v406_v2 = vld [vmem:[#allocation8 + $0x68] sm:$0xff]  ;;  %v405_v3 = vld [vmem:[#allocation8 + $0x60] sm:$0xff]  ;;  %v404_v6 = vld [vmem:[#allocation8 + $0x58] sm:$0xff] }
  0x14   :  { %s527_s5 = sld [smem:[#allocation4 + $0x2]]  ;;  %v403_v10 = vld [vmem:[#allocation8 + $0x50] sm:$0xff]  ;;  %v402_v14 = vld [vmem:[#allocation8 + $0x48] sm:$0xff]  ;;  %v401_v20 = vld [vmem:[#allocation8 + $0x40] sm:$0xff] }
  0x15   :  { %s528_s6 = sld [smem:[#allocation4 + $0x3]]  ;;  %414 = vmatpush.msra.mxu0 %v407_v1  ;;  %v400_v24 = vld [vmem:[#allocation8 + $0x38] sm:$0xff]  ;;  %v399_v27 = vld [vmem:[#allocation8 + $0x30] sm:$0xff]  ;;  %v398_v32 = vld [vmem:[#allocation8 + $0x28] sm:$0xff] }
  0x16   :  { %s529_s7 = sld [smem:[#allocation4 + $0x4]]  ;;  %v397_v37 = vld [vmem:[#allocation8 + $0x20] sm:$0xff]  ;;  %v396_v41 = vld [vmem:[#allocation8 + $0x18] sm:$0xff]  ;;  %v395_v46 = vld [vmem:[#allocation8 + $0x10] sm:$0xff] }
  0x17   :  { %s732_s8 = sld [smem:[#allocation4 + $0x5]]  ;;  %415 = vmatpush.msra.mxu0 %v406_v2  ;;  %v394_v50 = vld [vmem:[#allocation8 + $0x8] sm:$0xff]  ;;  %v393_v53 = vld [vmem:[#allocation8] sm:$0xff] }
  0x18   :  { %s734_s2 = sld [smem:[#allocation4 + $0x6]]  ;;  %s59_s13 = scalar_lea.vmem [#allocation5], %s58_s1 }
  0x19   :  { %s736_s9 = sld [smem:[#allocation4 + $0x7]]  ;;  %v60_v4 = vld [vmem:[%s59_s13] sm:$0x1]  ;;  %s64_s14 = scalar_lea.vmem [#allocation5], %s526_s30  ;;  %416 = vmatpush.msra.mxu0 %v405_v3 }
  0x1a   :  { %s533_s10 = sld [smem:[#allocation4 + $0x8]]  ;;  %v65_v5 = vld [vmem:[%s64_s14] sm:$0x1]  ;;  %s69_s15 = scalar_lea.vmem [#allocation5], %s527_s5 }
  0x1b   :  { %s534_s11 = sld [smem:[#allocation4 + $0x9]]  ;;  %v66_v7 = vadd.f32 %v65_v5, %v60_v4  ;;  %v70_v8 = vld [vmem:[%s69_s15] sm:$0x1]  ;;  %s74_s16 = scalar_lea.vmem [#allocation5], %s528_s6  ;;  %417 = vmatpush.msra.mxu0 %v404_v6 }
  0x1c   :  { %s738_s12 = sld [smem:[#allocation4 + $0xa]]  ;;  %v75_v9 = vld [vmem:[%s74_s16] sm:$0x1]  ;;  %s79_s17 = scalar_lea.vmem [#allocation5], %s529_s7 }
  0x1d   :  { %v71_v11 = vadd.f32 %v70_v8, %v66_v7  ;;  %v80_v12 = vld [vmem:[%s79_s17] sm:$0x1]  ;;  %s740_s19 = sld [smem:[#allocation4 + $0xb]]  ;;  %418 = vmatpush.msra.mxu0 %v403_v10  ;;  %s84_s22 = scalar_lea.vmem [#allocation5], %s732_s8 }
  0x1e   :  { %s742_s21 = sld [smem:[#allocation4 + $0xc]]  ;;  %v85_v17 = vld [vmem:[%s84_s22] sm:$0x1]  ;;  %s89_s0 = scalar_lea.vmem [#allocation5], %s734_s2 }
  0x1f   :  { %v76_v15 = vadd.f32 %v75_v9, %v71_v11  ;;  %s746_s24 = sld [smem:[#allocation4 + $0xd]]  ;;  %419 = vmatpush.msra.mxu0 %v402_v14  ;;  %v90_v22 = vld [vmem:[%s89_s0] sm:$0x1]  ;;  %s94_s28 = scalar_lea.vmem [#allocation5], %s736_s9 }
  0x20   :  { %s101_s18 = scalar_lea.vmem [#allocation5], %s533_s10  ;;  %s748_s25 = sld [smem:[#allocation4 + $0xe]]  ;;  %v95_v26 = vld [vmem:[%s94_s28] sm:$0x1] }
  0x21   :  { %v102_v13 = vld [vmem:[%s101_s18] sm:$0x1]  ;;  %s106_s20 = scalar_lea.vmem [#allocation5], %s534_s11  ;;  %v81_v21 = vadd.f32 %v80_v12, %v76_v15  ;;  %s751_s26 = sld [smem:[#allocation4 + $0xf]]  ;;  %420 = vmatpush.msra.mxu0 %v401_v20 }
  0x22   :  { %v107_v16 = vld [vmem:[%s106_s20] sm:$0x1]  ;;  %s111_s23 = scalar_lea.vmem [#allocation5], %s738_s12  ;;  %s753_s27 = sld [smem:[#allocation4 + $0x10]] }
  0x23   :  { %v108_v18 = vadd.f32 %v107_v16, %v102_v13  ;;  %v112_v19 = vld [vmem:[%s111_s23] sm:$0x1]  ;;  %v86_v25 = vadd.f32 %v85_v17, %v81_v21  ;;  %s756_s29 = sld [smem:[#allocation4 + $0x11]]  ;;  %s116_s1 = scalar_lea.vmem [#allocation5], %s740_s19  ;;  %421 = vmatpush.msra.mxu0 %v400_v24 }
  0x24   :  { %v117_v29 = vld [vmem:[%s116_s1] sm:$0x1]  ;;  %s759_s30 = sld [smem:[#allocation4 + $0x12]]  ;;  %s121_s5 = scalar_lea.vmem [#allocation5], %s742_s21 }
  0x25   :  { %v113_v23 = vadd.f32 %v112_v19, %v108_v18  ;;  %v91_v28 = vadd.f32 %v90_v22, %v86_v25  ;;  %v122_v31 = vld [vmem:[%s121_s5] sm:$0x1]  ;;  %s762_s6 = sld [smem:[#allocation4 + $0x13]]  ;;  %s126_s7 = scalar_lea.vmem [#allocation5], %s746_s24  ;;  %422 = vmatpush.msra.mxu0 %v399_v27 }
  0x26   :  { %v127_v34 = vld [vmem:[%s126_s7] sm:$0x1]  ;;  %s765_s8 = sld [smem:[#allocation4 + $0x14]]  ;;  %s131_s2 = scalar_lea.vmem [#allocation5], %s748_s25 }
  0x27   :  { %v118_v30 = vadd.f32 %v117_v29, %v113_v23  ;;  %v96_v33 = vadd.f32 %v95_v26, %v91_v28  ;;  %v132_v36 = vld [vmem:[%s131_s2] sm:$0x1]  ;;  %s768_s9 = sld [smem:[#allocation4 + $0x15]]  ;;  %s136_s10 = scalar_lea.vmem [#allocation5], %s751_s26  ;;  %423 = vmatpush.msra.mxu0 %v398_v32 }
  0x28   :  { %v137_v38 = vld [vmem:[%s136_s10] sm:$0x1]  ;;  %s143_s11 = scalar_lea.vmem [#allocation5], %s753_s27  ;;  %s772_s12 = sld [smem:[#allocation4 + $0x16]] }
  0x29   :  { %v123_v35 = vadd.f32 %v122_v31, %v118_v30  ;;  %97 = vst [vmem:[#allocation2] sm:$0x1] %v96_v33  ;;  %v144_v40 = vld [vmem:[%s143_s11] sm:$0x1]  ;;  %s148_s13 = scalar_lea.vmem [#allocation5], %s756_s29  ;;  %s775_s14 = sld [smem:[#allocation4 + $0x17]]  ;;  %424 = vmatpush.msra.mxu0 %v397_v37 }
  0x2a   :  { %v149_v42 = vld [vmem:[%s148_s13] sm:$0x1]  ;;  %s153_s15 = scalar_lea.vmem [#allocation5], %s759_s30  ;;  %s778_s16 = sld [smem:[#allocation4 + $0x18]] }
  0x2b   :  { %v128_v39 = vadd.f32 %v127_v34, %v123_v35  ;;  %v150_v44 = vadd.f32 %v149_v42, %v144_v40  ;;  %v154_v45 = vld [vmem:[%s153_s15] sm:$0x1]  ;;  %s158_s17 = scalar_lea.vmem [#allocation5], %s762_s6  ;;  %s781_s18 = sld [smem:[#allocation4 + $0x19]]  ;;  %425 = vmatpush.msra.mxu0 %v396_v41 }
  0x2c   :  { %v159_v47 = vld [vmem:[%s158_s17] sm:$0x1]  ;;  %s783_s19 = sld [smem:[#allocation4 + $0x1a]]  ;;  %s163_s20 = scalar_lea.vmem [#allocation5], %s765_s8 }
  0x2d   :  { %v133_v43 = vadd.f32 %v132_v36, %v128_v39  ;;  %v155_v49 = vadd.f32 %v154_v45, %v150_v44  ;;  %v164_v51 = vld [vmem:[%s163_s20] sm:$0x1]  ;;  %s786_s21 = sld [smem:[#allocation4 + $0x1b]]  ;;  %426 = vmatpush.msra.mxu0 %v395_v46  ;;  %s168_s23 = scalar_lea.vmem [#allocation5], %s768_s9 }
  0x2e   :  { %s788_s22 = sld [smem:[#allocation4 + $0x1c]]  ;;  %v169_v54 = vld [vmem:[%s168_s23] sm:$0x1]  ;;  %s173_s25 = scalar_lea.vmem [#allocation5], %s772_s12 }
  0x2f   :  { %v138_v48 = vadd.f32 %v137_v38, %v133_v43  ;;  %v160_v52 = vadd.f32 %v159_v47, %v155_v49  ;;  %s791_s24 = sld [smem:[#allocation4 + $0x1d]]  ;;  %427 = vmatpush.msra.mxu0 %v394_v50  ;;  %v174_v56 = vld [vmem:[%s173_s25] sm:$0x1]  ;;  %s178_s26 = scalar_lea.vmem [#allocation5], %s775_s14 }
  0x30   :  { %s794_s0 = sld [smem:[#allocation4 + $0x1e]]  ;;  %v179_v57 = vld [vmem:[%s178_s26] sm:$0x1]  ;;  %s185_s27 = scalar_lea.vmem [#allocation5], %s778_s16 }
  0x31   :  { %139 = vst [vmem:[#allocation2 + $0x1] sm:$0x1] %v138_v48  ;;  %v165_v55 = vadd.f32 %v164_v51, %v160_v52  ;;  %v186_v58 = vld [vmem:[%s185_s27] sm:$0x1]  ;;  %s798_s28 = sld [smem:[#allocation4 + $0x1f]]  ;;  %428 = vmatpush.msra.mxu0 %v393_v53  ;;  %s190_s29 = scalar_lea.vmem [#allocation5], %s781_s18 }
  0x32   :  { %v191_v60 = vld [vmem:[%s190_s29] sm:$0x1]  ;;  %s557_s1 = sld [smem:[#allocation4 + $0x20]]  ;;  %s195_s30 = scalar_lea.vmem [#allocation5], %s783_s19 }
  0x33   :  { %v170_v59 = vadd.f32 %v169_v54, %v165_v55  ;;  %v192_v61 = vadd.f32 %v191_v60, %v186_v58  ;;  %v196_v62 = vld [vmem:[%s195_s30] sm:$0x1]  ;;  %s558_s5 = sld [smem:[#allocation4 + $0x21]]  ;;  %s200_s6 = scalar_lea.vmem [#allocation5], %s786_s21 }
  0x34   :  { %v201_v0 = vld [vmem:[%s200_s6] sm:$0x1]  ;;  %s559_s7 = sld [smem:[#allocation4 + $0x22]]  ;;  %s205_s2 = scalar_lea.vmem [#allocation5], %s788_s22 }
  0x35   :  { %v175_v63 = vadd.f32 %v174_v56, %v170_v59  ;;  %v197_v1 = vadd.f32 %v196_v62, %v192_v61  ;;  %s560_s8 = sld [smem:[#allocation4 + $0x23]]  ;;  %v206_v3 = vld [vmem:[%s205_s2] sm:$0x1]  ;;  %s210_s10 = scalar_lea.vmem [#allocation5], %s791_s24 }
  0x36   :  { %s804_s9 = sld [smem:[#allocation4 + $0x24]]  ;;  %v211_v5 = vld [vmem:[%s210_s10] sm:$0x1]  ;;  %s215_s12 = scalar_lea.vmem [#allocation5], %s794_s0 }
  0x37   :  { %v180_v2 = vadd.f32 %v179_v57, %v175_v63  ;;  %v202_v4 = vadd.f32 %v201_v0, %v197_v1  ;;  %s807_s11 = sld [smem:[#allocation4 + $0x25]]  ;;  %v216_v6 = vld [vmem:[%s215_s12] sm:$0x1]  ;;  %s220_s15 = scalar_lea.vmem [#allocation5], %s798_s28 }
  0x38   :  { %s227_s13 = scalar_lea.vmem [#allocation5], %s557_s1  ;;  %s810_s14 = sld [smem:[#allocation4 + $0x26]]  ;;  %v221_v9 = vld [vmem:[%s220_s15] sm:$0x1] }
  0x39   :  { %181 = vst [vmem:[#allocation2 + $0x2] sm:$0x1] %v180_v2  ;;  %v207_v7 = vadd.f32 %v206_v3, %v202_v4  ;;  %v228_v8 = vld [vmem:[%s227_s13] sm:$0x1]  ;;  %s232_s16 = scalar_lea.vmem [#allocation5], %s558_s5  ;;  %s564_s17 = sld [smem:[#allocation4 + $0x27]] }
  0x3a   :  { %v233_v10 = vld [vmem:[%s232_s16] sm:$0x1]  ;;  %s237_s18 = scalar_lea.vmem [#allocation5], %s559_s7  ;;  %s565_s19 = sld [smem:[#allocation4 + $0x28]] }
  0x3b   :  { %v212_v11 = vadd.f32 %v211_v5, %v207_v7  ;;  %v234_v12 = vadd.f32 %v233_v10, %v228_v8  ;;  %v238_v13 = vld [vmem:[%s237_s18] sm:$0x1]  ;;  %s242_s20 = scalar_lea.vmem [#allocation5], %s560_s8  ;;  %s566_s21 = sld [smem:[#allocation4 + $0x29]] }
  0x3c   :  { %v243_v14 = vld [vmem:[%s242_s20] sm:$0x1]  ;;  %s567_s22 = sld [smem:[#allocation4 + $0x2a]]  ;;  %s247_s23 = scalar_lea.vmem [#allocation5], %s804_s9 }
  0x3d   :  { %v217_v15 = vadd.f32 %v216_v6, %v212_v11  ;;  %v239_v16 = vadd.f32 %v238_v13, %v234_v12  ;;  %v248_v17 = vld [vmem:[%s247_s23] sm:$0x1]  ;;  %s568_s24 = sld [smem:[#allocation4 + $0x2b]]  ;;  %s252_s0 = scalar_lea.vmem [#allocation5], %s807_s11 }
  0x3e   :  { %s814_s25 = sld [smem:[#allocation4 + $0x2c]]  ;;  %v253_v20 = vld [vmem:[%s252_s0] sm:$0x1]  ;;  %s257_s27 = scalar_lea.vmem [#allocation5], %s810_s14 }
  0x3f   :  { %v222_v18 = vadd.f32 %v221_v9, %v217_v15  ;;  %v244_v19 = vadd.f32 %v243_v14, %v239_v16  ;;  %s817_s26 = sld [smem:[#allocation4 + $0x2d]]  ;;  %v258_v22 = vld [vmem:[%s257_s27] sm:$0x1]  ;;  %s262_s28 = scalar_lea.vmem [#allocation5], %s564_s17 }
  0x40   :  { %v263_v23 = vld [vmem:[%s262_s28] sm:$0x1]  ;;  %s269_s29 = scalar_lea.vmem [#allocation5], %s565_s19  ;;  %s571_s1 = sld [smem:[#allocation4 + $0x2e]] }
  0x41   :  { %223 = vst [vmem:[#allocation2 + $0x3] sm:$0x1] %v222_v18  ;;  %v249_v21 = vadd.f32 %v248_v17, %v244_v19  ;;  %v270_v24 = vld [vmem:[%s269_s29] sm:$0x1]  ;;  %s274_s30 = scalar_lea.vmem [#allocation5], %s566_s21  ;;  %s572_s5 = sld [smem:[#allocation4 + $0x2f]] }
  0x42   :  { %v275_v26 = vld [vmem:[%s274_s30] sm:$0x1]  ;;  %s279_s6 = scalar_lea.vmem [#allocation5], %s567_s22  ;;  %s573_s7 = sld [smem:[#allocation4 + $0x30]] }
  0x43   :  { %v254_v25 = vadd.f32 %v253_v20, %v249_v21  ;;  %v276_v27 = vadd.f32 %v275_v26, %v270_v24  ;;  %v280_v28 = vld [vmem:[%s279_s6] sm:$0x1]  ;;  %s284_s8 = scalar_lea.vmem [#allocation5], %s568_s24  ;;  %s574_s2 = sld [smem:[#allocation4 + $0x31]] }
  0x44   :  { %v285_v30 = vld [vmem:[%s284_s8] sm:$0x1]  ;;  %s575_s9 = sld [smem:[#allocation4 + $0x32]]  ;;  %s289_s10 = scalar_lea.vmem [#allocation5], %s814_s25 }
  0x45   :  { %v259_v29 = vadd.f32 %v258_v22, %v254_v25  ;;  %v281_v31 = vadd.f32 %v280_v28, %v276_v27  ;;  %v290_v33 = vld [vmem:[%s289_s10] sm:$0x1]  ;;  %s576_s11 = sld [smem:[#allocation4 + $0x33]]  ;;  %s294_s13 = scalar_lea.vmem [#allocation5], %s817_s26 }
  0x46   :  { %s821_s12 = sld [smem:[#allocation4 + $0x34]]  ;;  %v295_v35 = vld [vmem:[%s294_s13] sm:$0x1]  ;;  %s299_s14 = scalar_lea.vmem [#allocation5], %s571_s1 }
  0x47   :  { %v264_v32 = vadd.f32 %v263_v23, %v259_v29  ;;  %v286_v34 = vadd.f32 %v285_v30, %v281_v31  ;;  %v300_v37 = vld [vmem:[%s299_s14] sm:$0x1]  ;;  %s578_s15 = sld [smem:[#allocation4 + $0x35]]  ;;  %s304_s16 = scalar_lea.vmem [#allocation5], %s572_s5 }
  0x48   :  { %v305_v38 = vld [vmem:[%s304_s16] sm:$0x1]  ;;  %s311_s17 = scalar_lea.vmem [#allocation5], %s573_s7  ;;  %s579_s18 = sld [smem:[#allocation4 + $0x36]] }
  0x49   :  { %265 = vst [vmem:[#allocation2 + $0x4] sm:$0x1] %v264_v32  ;;  %v291_v36 = vadd.f32 %v290_v33, %v286_v34  ;;  %v312_v39 = vld [vmem:[%s311_s17] sm:$0x1]  ;;  %s316_s19 = scalar_lea.vmem [#allocation5], %s574_s2  ;;  %s824_s20 = sld [smem:[#allocation4 + $0x37]] }
  0x4a   :  { %v317_v41 = vld [vmem:[%s316_s19] sm:$0x1]  ;;  %s321_s21 = scalar_lea.vmem [#allocation5], %s575_s9  ;;  %s581_s22 = sld [smem:[#allocation4 + $0x38]] }
  0x4b   :  { %v296_v40 = vadd.f32 %v295_v35, %v291_v36  ;;  %v318_v42 = vadd.f32 %v317_v41, %v312_v39  ;;  %v322_v43 = vld [vmem:[%s321_s21] sm:$0x1]  ;;  %s326_s23 = scalar_lea.vmem [#allocation5], %s576_s11  ;;  %s582_s24 = sld [smem:[#allocation4 + $0x39]] }
  0x4c   :  { %v327_v45 = vld [vmem:[%s326_s23] sm:$0x1]  ;;  %s583_s25 = sld [smem:[#allocation4 + $0x3a]]  ;;  %s331_s0 = scalar_lea.vmem [#allocation5], %s821_s12 }
  0x4d   :  { %v301_v44 = vadd.f32 %v300_v37, %v296_v40  ;;  %v323_v46 = vadd.f32 %v322_v43, %v318_v42  ;;  %v332_v48 = vld [vmem:[%s331_s0] sm:$0x1]  ;;  %s584_s26 = sld [smem:[#allocation4 + $0x3b]]  ;;  %s336_s28 = scalar_lea.vmem [#allocation5], %s578_s15 }
  0x4e   :  { %s585_s27 = sld [smem:[#allocation4 + $0x3c]]  ;;  %v337_v50 = vld [vmem:[%s336_s28] sm:$0x1]  ;;  %s341_s29 = scalar_lea.vmem [#allocation5], %s579_s18 }
  0x4f   :  { %v306_v47 = vadd.f32 %v305_v38, %v301_v44  ;;  %v328_v49 = vadd.f32 %v327_v45, %v323_v46  ;;  %v342_v52 = vld [vmem:[%s341_s29] sm:$0x1]  ;;  %s586_s1 = sld [smem:[#allocation4 + $0x3d]]  ;;  %s346_s8 = scalar_lea.vmem [#allocation5], %s824_s20 }
  0x50   :  { %s353_s30 = scalar_lea.vmem [#allocation5], %s581_s22  ;;  %s587_s5 = sld [smem:[#allocation4 + $0x3e]]  ;;  %v347_v56 = vld [vmem:[%s346_s8] sm:$0x1] }
  0x51   :  { %307 = vst [vmem:[#allocation2 + $0x5] sm:$0x1] %v306_v47  ;;  %v333_v51 = vadd.f32 %v332_v48, %v328_v49  ;;  %v354_v53 = vld [vmem:[%s353_s30] sm:$0x1]  ;;  %s358_s6 = scalar_lea.vmem [#allocation5], %s582_s24  ;;  %s588_s7 = sld [smem:[#allocation4 + $0x3f]] }
  0x52   :  { %v359_v55 = vld [vmem:[%s358_s6] sm:$0x1]  ;;  %s363_s2 = scalar_lea.vmem [#allocation5], %s583_s25  ;;  %s697_s16 = smov [#allocation10]  }
  0x53   :  { %v338_v54 = vadd.f32 %v337_v50, %v333_v51  ;;  %v360_v57 = vadd.f32 %v359_v55, %v354_v53  ;;  %v364_v58 = vld [vmem:[%s363_s2] sm:$0x1]  ;;  %s368_s9 = scalar_lea.vmem [#allocation5], %s584_s26  ;;  %s449_s17 = sshll.u32 %s697_s16, 4  ;;  %s450_s17 = int_to_ptr.vmem [resolvable:$true] %s449_s17 }
  0x54   :  { %v369_v60 = vld [vmem:[%s368_s9] sm:$0x1]  ;;  %s373_s10 = scalar_lea.vmem [#allocation5], %s585_s27  ;;  %s451_s20 = sshll.u32 %s838_s4, 4  ;;  %s452_s20 = int_to_ptr.hbm [resolvable:$true] %s451_s20 }
  0x55   :  { %v343_v59 = vadd.f32 %v342_v52, %v338_v54  ;;  %v365_v61 = vadd.f32 %v364_v58, %v360_v57  ;;  %v374_v63 = vld [vmem:[%s373_s10] sm:$0x1]  ;;  %s378_s11 = scalar_lea.vmem [#allocation5], %s586_s1 }
  0x56   :  { %v379_v1 = vld [vmem:[%s378_s11] sm:$0x1]  ;;  %s383_s12 = scalar_lea.vmem [#allocation5], %s587_s5 }
  0x57   :  { %v348_v62 = vadd.f32 %v347_v56, %v343_v59  ;;  %v370_v0 = vadd.f32 %v369_v60, %v365_v61  ;;  %v384_v3 = vld [vmem:[%s383_s12] sm:$0x1]  ;;  %s388_s13 = scalar_lea.vmem [#allocation5], %s588_s7 }
  0x58   :  { %v389_v5 = vld [vmem:[%s388_s13] sm:$0x1] }
  0x59   :  { %349 = vst [vmem:[#allocation2 + $0x6] sm:$0x1] %v348_v62  ;;  %v375_v2 = vadd.f32 %v374_v63, %v370_v0  ;;  %v595_v9 = vld [vmem:[%s837_s3] ss:$0 sm:$0xff] }
  0x5b   :  { %v380_v4 = vadd.f32 %v379_v1, %v375_v2 }
  0x5d   :  { %v385_v6 = vadd.f32 %v384_v3, %v380_v4 }
  0x5f   :  { %v390_v7 = vadd.f32 %v389_v5, %v385_v6 }
  0x61   :  { %391 = vst [vmem:[#allocation2 + $0x7] sm:$0x1] %v390_v7 }
  0x68   :  { %v392_v8 = vld [vmem:[#allocation2] sm:$0xff] }
  0x69   :  { %429 = vmatmul.f32.vlgmr.msra.gmra.mxu0 %v392_v8 }
  0xe6   :  { %v430_v10 = vpop.f32.mrf.mxu0 }
  0xe7   :  { %v431_v11 = vadd.f32 %v595_v9, %v430_v10 }
  0xe9   :  { %433 = vmax.xlane.f32.xlu0 %v431_v11 }
 0x15c   :  { %v434_v12 = vpop.xlane.xlu0 %433 }
 0x15d   :  { %v435_v13 = vsub.f32 %v431_v11, %v434_v12 }
 0x15f   :  { %v436_v14 = vmul.f32 1.442695, %v435_v13 }
 0x161   :  { %596 = vpow2.f32 %v436_v14 }
 0x167   :  { %v597_v15 = vpop.eup %596 }
 0x168   :  { %438 = vadd.xlane.f32.xlu0 %v597_v15 }
 0x1db   :  { %v439_v16 = vpop.xlane.xlu0 %438 }
 0x1dc   :  { %598 = vlog2.f32 %v439_v16 }
 0x1e2   :  { %v599_v17 = vpop.eup %598 }
 0x1e3   :  { %v441_v18 = vmul.f32 0.6931472, %v599_v17 }
 0x1e5   :  { %v442_v19 = vsub.f32 %v435_v13, %v441_v18 }
 0x1e7   :  { %443 = vst [vmem:[#allocation10] sm:$0xff] %v442_v19 }
 0x1e8   :  { %454 = dma.vmem_to_hbm [thread:$0]  %s450_s17, 128, %s452_s20, [#allocation7]  }
 0x1e9   :  { %690 = dma.done.wait [#allocation7], 128  }
 0x1ea   :  { %691 = vsyncadd [#allocation7], 4294967168 }
 0x1eb   :  { %459 = vsyncpa [#allocation6], 1 }
 0x1ec   :  { %460 = vsyncpa [#allocation9], 1 }
 0x1ed   :  { %461 = vsyncpa [#allocation7], 1 }

</bundles_post_ra>
